<compile_context>
chip_gen: v7x
topology: tpu7x:2x2x1
jax: 0.10.0
libtpu: 0.0.40
codegen_flags: <defaults>
</compile_context>

<pallas_src>
import math
import functools

import jax
import jax.numpy as jnp
from jax.experimental import pallas as pl
from jax.experimental.pallas import tpu as pltpu


# ---------------------------------------------------------------------------
# Parameter setup (plain JAX): sinusoidal PE table exactly as PyTorch __init__.
# ---------------------------------------------------------------------------
def build_pe_table(d_model: int, max_len: int) -> jnp.ndarray:
    position = jnp.arange(0, max_len, dtype=jnp.float32)[:, None]            # (L, 1)
    div_term = jnp.exp(
        jnp.arange(0, d_model, 2, dtype=jnp.float32)
        * -(math.log(10000.0) / d_model)
    )                                                                        # (D/2,)
    pe = jnp.zeros((max_len, d_model), dtype=jnp.float32)
    pe = pe.at[:, 0::2].set(jnp.sin(position * div_term))
    pe = pe.at[:, 1::2].set(jnp.cos(position * div_term))
    return pe                                                                # (L, D)


# ---------------------------------------------------------------------------
# Kernels (elementwise, HBM-bandwidth bound)
# ---------------------------------------------------------------------------
def _pe_add_kernel(x_ref, pe_ref, o_ref):
    # x_ref: (TB, TC) block of the flattened (B, S*D) input.
    # pe_ref: (1, TC) block of the flattened PE row, broadcast over batch rows.
    y = x_ref[...].astype(jnp.float32) + pe_ref[...].astype(jnp.float32)
    o_ref[...] = y.astype(o_ref.dtype)


def _pe_add_dropout_kernel(x_ref, pe_ref, u_ref, o_ref, *, p: float):
    # Inverted dropout (matches nn.Dropout): drop with prob p, scale by 1/(1-p).
    y = x_ref[...].astype(jnp.float32) + pe_ref[...].astype(jnp.float32)
    keep = u_ref[...] >= jnp.float32(p)
    scale = jnp.float32(1.0 / (1.0 - p))
    y = jnp.where(keep, y * scale, jnp.float32(0.0))
    o_ref[...] = y.astype(o_ref.dtype)


# ---------------------------------------------------------------------------
# Tile selection: obey TPU (8, 128) block rules, keep each tile ~<= 2 MiB so
# double-buffered streams fit under v5e/v6e/v7x scoped-VMEM limits.
# ---------------------------------------------------------------------------
def _choose_tiles(batch: int, flat_cols: int, bytes_per_elem: int,
                  target_tile_bytes: int = 2 << 20):
    # Column tile over the flattened (S*D) axis -> always lane-dense.
    if flat_cols < 128 or flat_cols * bytes_per_elem <= target_tile_bytes:
        tc = flat_cols                                    # full dim is always legal
    else:
        tc = max(128, (target_tile_bytes // bytes_per_elem) // 128 * 128)

    # Row (batch) tile: multiple of 8 or the full batch.
    if batch <= 8 or batch * tc * bytes_per_elem <= target_tile_bytes:
        tb = batch
    else:
        tb = max(8, (target_tile_bytes // (tc * bytes_per_elem)) // 8 * 8)
        tb = min(tb, batch)                               # == batch (full) if smaller
    return tb, tc


# ---------------------------------------------------------------------------
# Wrapper
# ---------------------------------------------------------------------------
def positional_encoding_forward(
    x: jnp.ndarray,          # (B, S, D)
    pe: jnp.ndarray,         # (max_len, D) float32
    *,
    dropout_p: float = 0.0,
    training: bool = False,
    rng: jax.Array | None = None,
) -> jnp.ndarray:
    B, S, D = x.shape
    assert pe.shape[1] == D and pe.shape[0] >= S
    SD = S * D

    # Lane-dense flattened views (free reshapes for contiguous arrays).
    x2 = x.reshape(B, SD)
    pe2 = pe[:S].reshape(1, SD).astype(x.dtype)

    bpe = jnp.dtype(x.dtype).itemsize
    tb, tc = _choose_tiles(B, SD, bpe)
    grid = (pl.cdiv(B, tb), pl.cdiv(SD, tc))

    x_spec = pl.BlockSpec((tb, tc), lambda i, j: (i, j))
    pe_spec = pl.BlockSpec((1, tc), lambda i, j: (0, j))
    out_spec = pl.BlockSpec((tb, tc), lambda i, j: (i, j))

    use_dropout = bool(training) and float(dropout_p) > 0.0

    # Explicit VMEM budget: double-buffered x/out/pe(/uniform) tiles + slack.
    tile_bytes = tb * tc * bpe
    n_streams = 3 + (1 if use_dropout else 0)
    need = 2 * n_streams * max(tile_bytes, tc * 4)
    vmem_limit = int(min(max(int(need * 1.25) + (2 << 20), 16 << 20), 48 << 20))

    compiler_params = pltpu.CompilerParams(
        dimension_semantics=("parallel", "parallel"),   # grid steps are independent
        vmem_limit_bytes=vmem_limit,
    )

    if use_dropout:
        if rng is None:
            rng = jax.random.PRNGKey(0)
        # TODO(synk): on real TPU hardware the uniforms could be generated
        # in-kernel via pltpu.prng_random_bits to avoid this extra HBM read;
        # kept host-side so the kernel also lowers in CPU interpret mode.
        u = jax.random.uniform(rng, (B, SD), dtype=jnp.float32)
        u_spec = pl.BlockSpec((tb, tc), lambda i, j: (i, j))
        kernel = functools.partial(_pe_add_dropout_kernel, p=float(dropout_p))
        out2 = pl.pallas_call(
            kernel,
            out_shape=jax.ShapeDtypeStruct((B, SD), x.dtype),
            grid=grid,
            in_specs=[x_spec, pe_spec, u_spec],
            out_specs=out_spec,
            compiler_params=compiler_params,
        )(x2, pe2, u)
    else:
        out2 = pl.pallas_call(
            _pe_add_kernel,
            out_shape=jax.ShapeDtypeStruct((B, SD), x.dtype),
            grid=grid,
            in_specs=[x_spec, pe_spec],
            out_specs=out_spec,
            compiler_params=compiler_params,
        )(x2, pe2)

    return out2.reshape(B, S, D)


# ---------------------------------------------------------------------------
# Demo / correctness check
# ---------------------------------------------------------------------------
if __name__ == "__main__":
    d_model, max_len = 32, 64
    batch, seq = 2, 8
    dropout_p = 0.1

    key = jax.random.PRNGKey(0)
    kx, kd = jax.random.split(key)
    x = jax.random.normal(kx, (batch, seq, d_model), dtype=jnp.float32)
    pe = build_pe_table(d_model, max_len)

    ref = x + pe[None, :seq, :]

    # Eval mode (dropout = identity): must match the pure-JAX reference.
    y_eval = jax.block_until_ready(
        positional_encoding_forward(x, pe, dropout_p=dropout_p, training=False)
    )
    assert y_eval.shape == (batch, seq, d_model)
    assert jnp.allclose(y_eval, ref, atol=1e-6, rtol=1e-6), "eval-mode mismatch"

    # Train mode (dropout active): kept elements must equal the scaled reference.
    y_train = jax.block_until_ready(
        positional_encoding_forward(
            x, pe, dropout_p=dropout_p, training=True, rng=kd
        )
    )
    assert y_train.shape == (batch, seq, d_model)
    assert bool(jnp.all(jnp.isfinite(y_train)))
    kept = y_train != 0.0
    scale = 1.0 / (1.0 - dropout_p)
    assert jnp.allclose(
        jnp.where(kept, y_train, 0.0),
        jnp.where(kept, ref * scale, 0.0),
        atol=1e-5, rtol=1e-5,
    ), "train-mode kept-element mismatch"

    print("KERNEL_OK")
</pallas_src>

<mosaic_0001>
module attributes {stable_mosaic.version = 11 : i64} {
  func.func @_pe_add_kernel(%arg0: i32, %arg1: i32, %arg2: memref<2x256xf32, #tpu.memory_space<vmem>>, %arg3: memref<1x256xf32, #tpu.memory_space<vmem>>, %arg4: memref<2x256xf32, #tpu.memory_space<vmem>>) attributes {dimension_semantics = [#tpu.dimension_semantics<parallel>, #tpu.dimension_semantics<parallel>], iteration_bounds = array<i64: 1, 1>, scalar_prefetch = 0 : i64, scratch_operands = 0 : i64, tpu.core_type = #tpu.core_type<tc>, window_params = [{transform_indices = @transform_0, window_bounds = array<i64: 2, 256>}, {transform_indices = @transform_1, window_bounds = array<i64: 1, 256>}, {transform_indices = @transform_2, window_bounds = array<i64: 2, 256>}]} {
    %c0 = arith.constant 0 : index
    %c0_0 = arith.constant 0 : index
    %0 = vector.load %arg2[%c0, %c0_0] : memref<2x256xf32, #tpu.memory_space<vmem>>, vector<2x256xf32>
    %c0_1 = arith.constant 0 : index
    %c0_2 = arith.constant 0 : index
    %1 = vector.load %arg3[%c0_1, %c0_2] : memref<1x256xf32, #tpu.memory_space<vmem>>, vector<1x256xf32>
    %2 = vector.broadcast %1 : vector<1x256xf32> to vector<2x256xf32>
    %3 = arith.addf %0, %2 : vector<2x256xf32>
    %c0_3 = arith.constant 0 : index
    %c0_4 = arith.constant 0 : index
    %4 = vector.load %arg4[%c0_3, %c0_4] : memref<2x256xf32, #tpu.memory_space<vmem>>, vector<2x256xf32>
    tpu.vector_store %arg4[%c0_3, %c0_4], %3 {strides = array<i32>} : memref<2x256xf32, #tpu.memory_space<vmem>>, vector<2x256xf32>,
    return
  }
  func.func @transform_0(%arg0: i32, %arg1: i32) -> (i32, i32) {
    %c0_i32 = arith.constant 0 : i32
    return %arg0, %arg1 : i32, i32
  }
  func.func @transform_1(%arg0: i32, %arg1: i32) -> (i32, i32) {
    %c0_i32 = arith.constant 0 : i32
    %c0_i32_0 = arith.constant 0 : i32
    return %c0_i32, %arg1 : i32, i32
  }
  func.func @transform_2(%arg0: i32, %arg1: i32) -> (i32, i32) {
    %c0_i32 = arith.constant 0 : i32
    return %arg0, %arg1 : i32, i32
  }
}

</mosaic_0001>

<bundles_post_ra>
// kernel: tpu_custom_call.1
= control target key start
LH: loop header
LB: loop body
LE: loop exit
PB: predicated region body
PF: predicated region fallthrough
CT: control target
= control target key end

     0   :  { %7 = vsyncpa [#allocation3], 0  ;;  %s157_s0 = inlined_call_operand.hbm [shape: f32[2,256], index: 0, kind: input, shape index: {}]   ;;  %s158_s1 = inlined_call_operand.vmem [shape: f32[1,256], index: 1, kind: input, shape index: {}]   ;;  %s159_s2 = inlined_call_operand.hbm [shape: f32[2,256], index: 2, kind: output, shape index: {}]  }
   0x1   :  { %8 = vsyncpa [#allocation4], 0  ;;  %s112_s9 = smov [#allocation2]   ;;  %s64_s13 = scalar_lea.hbm %s157_s0, 64 }
   0x2   :  { %s15_s10 = sshll.u32 %s112_s9, 4  ;;  %p65_p0 = scmp.ne.s32.totalorder %s157_s0, %s64_s13  ;;  %s16_s10 = int_to_ptr.vmem [resolvable:$true] %s15_s10 }
   0x3   :  { %p68_p1 = scmp.lt.u32.totalorder %s64_s13, %s157_s0 }
   0x5   :  { %p70_p2 = pnand %p68_p1, %p65_p0 }
   0x7   :  { %73 = shalt.err (!%p70_p2)
}
   0x8   :  { %s74_s18 = scalar_lea.vmem %s16_s10, 64  ;;  %p79_p4 = scmp.lt.s32.totalorder %s16_s10, %s16_s10 }
   0x9   :  { %p75_p3 = scmp.ne.s32.totalorder %s16_s10, %s74_s18  ;;  %p80_p5 = scmp.lt.s32.totalorder %s74_s18, %s74_s18 }
   0xb   :  { %p81_p6 = por %p80_p5, %p79_p4 }
   0xd   :  { %p82_p7 = pnand %p81_p6, %p75_p3 }
   0xf   :  { %85 = shalt.err (!%p82_p7)
}
  0x10   :  { %18 = dma.hbm_to_vmem [thread:$0]  %s157_s0, 64, %s16_s10, [#allocation3]  }
  0x11   :  { %108 = dma.done.wait [#allocation3], 64  }
  0x12   :  { %109 = vsyncadd [#allocation3], 4294967232  ;;  %v27_v0 = vlaneseq  ;;  %v113_v1 = vmov 1983009808   ;;  %v25_v7 = vld [vmem:[%s158_s1] sm:$0x3] }
  0x13   :  { %v37_v2 = vunpack.c.l.s4 %v113_v1  ;;  %v24_v12 = vld [vmem:[#allocation2] sm:$0xf]  ;;  %s114_s23 = smov [#allocation5]  }
  0x14   :  { %v28_v3 = vshrl.u32 %v27_v0, 7  ;;  %s52_s0 = sshll.u32 %s114_s23, 4  ;;  %s53_s0 = int_to_ptr.vmem [resolvable:$true] %s52_s0 }
  0x15   :  { %v38_v6 = vunpack.c.0.s8 %v37_v2  ;;  %s86_s24 = scalar_lea.vmem %s53_s0, 64  ;;  %p91_p9 = scmp.lt.s32.totalorder %s53_s0, %s53_s0 }
  0x16   :  { %v29_v4 = vsub.s32 0, %v28_v3  ;;  %v33_v5 = vsub.s32 1, %v28_v3  ;;  %p87_p8 = scmp.ne.s32.totalorder %s53_s0, %s86_s24  ;;  %p92_p10 = scmp.lt.s32.totalorder %s86_s24, %s86_s24 }
  0x17   :  { %v41_v10 = vsub.s32 %v38_v6, %v28_v3 }
  0x18   :  { %v30_v8 = vrot.slane %v25_v7, %v29_v4  ;;  %v34_v9 = vrot.slane %v25_v7, %v33_v5  ;;  %p93_p11 = por %p92_p10, %p91_p9 }
  0x1a   :  { %v35_v11 = vcombine.low %v30_v8, %v34_v9  ;;  %p94_p12 = pnand %p93_p11, %p87_p8 }
  0x1c   :  { %v42_v13 = vrot.slane %v35_v11, %v41_v10 }
  0x1e   :  { %v44_v14 = vadd.f32 %v42_v13, %v24_v12 }
  0x20   :  { %45 = vst [vmem:[#allocation5] sm:$0xf] %v44_v14 }
  0x21   :  { %97 = shalt.err (!%p94_p12)
}
  0x22   :  { %s98_s26 = scalar_lea.hbm %s159_s2, 64 }
  0x23   :  { %p99_p13 = scmp.ne.s32.totalorder %s159_s2, %s98_s26  ;;  %p102_p0 = scmp.lt.u32.totalorder %s98_s26, %s159_s2 }
  0x25   :  { %p104_p1 = pnand %p102_p0, %p99_p13 }
  0x27   :  { %107 = shalt.err (!%p104_p1)
}
  0x28   :  { %55 = dma.vmem_to_hbm [thread:$0]  %s53_s0, 64, %s159_s2, [#allocation4]  }
  0x29   :  { %110 = dma.done.wait [#allocation4], 64  }
  0x2a   :  { %111 = vsyncadd [#allocation4], 4294967232 }
  0x2b   :  { %59 = vsyncpa [#allocation3], 1 }
  0x2c   :  { %60 = vsyncpa [#allocation4], 1 }

</bundles_post_ra>
